<compile_context>
chip_gen: v6e
topology: v6e:2x2x1
jax: 0.10.0
libtpu: 0.0.40
codegen_flags: <defaults>
</compile_context>

<pallas_src>
import jax
import jax.numpy as jnp
from jax.experimental import pallas as pl
from jax.experimental.pallas import tpu as pltpu


def _round_up(x, m):
    return ((x + m - 1) // m) * m


def _cdiv(a, b):
    return -(-a // b)


# ---------------------------------------------------------------------------
# Kernel
# ---------------------------------------------------------------------------
def _critic_kernel(s_ref, a_ref, w1s_ref, w1a_ref, b1_ref, w2_ref, b2_ref,
                   w3_ref, b3_ref, out_ref):
    """Fused 3-layer MLP: q = l3(relu(l2(relu(l1([state, action])))))."""
    w1s = w1s_ref[...]
    w1a = w1a_ref[...]
    w2 = w2_ref[...]
    wdt = w2.dtype                       # float32 or bfloat16 (MXU input dtype)

    # Layer 1: torch.cat([state, action], 1) @ W1 computed as two matmuls
    # against the pre-split W1 — no 128-lane padded x slab is ever built.
    h1 = jnp.dot(s_ref[...].astype(wdt), w1s,
                 preferred_element_type=jnp.float32)
    h1 = h1 + jnp.dot(a_ref[...].astype(wdt), w1a,
                      preferred_element_type=jnp.float32)
    h1 = jnp.maximum(h1 + b1_ref[...], 0.0)          # f32 bias + ReLU epilogue

    # Layer 2.
    h2 = jnp.dot(h1.astype(wdt), w2, preferred_element_type=jnp.float32)
    h2 = jnp.maximum(h2 + b2_ref[...], 0.0)

    # Layer 3 (out_features == 1): VPU multiply + XLU lane reduction instead
    # of a 1-column MXU matmul.  w3/b3 stay float32.
    q = jnp.sum(h2 * w3_ref[...], axis=-1, keepdims=True) + b3_ref[...]
    out_ref[...] = q.astype(out_ref.dtype)


# ---------------------------------------------------------------------------
# Wrapper
# ---------------------------------------------------------------------------
def _pick_tile_b(B, max_tile_b):
    b8 = _round_up(max(int(B), 1), 8)
    n_tiles = _cdiv(b8, max_tile_b)
    if n_tiles == 1 and b8 >= 256:
        # Give megacore chips (v7x: 2 TensorCores) at least two grid steps.
        n_tiles = 2
    return _round_up(_cdiv(b8, n_tiles), 8), b8


def critic_forward(state, action, packed_params, *, max_tile_b=512):
    """state: [B, state_dim], action: [B, action_dim] -> Q: [B, 1] float32."""
    w1s, w1a, b1, w2, b2, w3, b3 = packed_params
    B = state.shape[0]
    s_pad, h_pad = w1s.shape
    a_pad = w1a.shape[0]
    assert action.shape[0] == B
    assert state.shape[1] <= s_pad and action.shape[1] <= a_pad
    wbytes = jnp.dtype(w2.dtype).itemsize

    # ---- batch tiling (bounded padding waste) ----
    tile_b, b8 = _pick_tile_b(B, max_tile_b)

    # ---- VMEM budget against the actual chip (v5e/v6e: 128 MiB, v7x: 64) ----
    try:
        vmem_cap = int(pltpu.get_tpu_info().vmem_capacity_bytes)
    except Exception:          # conservative (v7x-sized) fallback
        vmem_cap = 64 << 20
    vmem_budget = (3 * vmem_cap) // 4

    def vmem_needed(tb):
        # Worst case: weights double-buffered (if Buffered(1) is unavailable).
        weights = 2 * wbytes * ((s_pad + a_pad) * h_pad + h_pad * h_pad)
        small = 2 * 4 * (3 * h_pad + 1)                     # b1, b2, w3, b3
        streamed = 4 * (2 * tb * (s_pad + a_pad) + 2 * tb)  # in/out tiles x2
        interm = 4 * 3 * tb * h_pad                         # h1, h2 + slack
        return weights + small + streamed + interm

    while tile_b > 8 and vmem_needed(tile_b) > vmem_budget:
        tile_b = max(8, _round_up(tile_b // 2, 8))

    n_tiles = _cdiv(b8, tile_b)
    b_pad = n_tiles * tile_b
    vmem_limit = int(min(max(2 * vmem_needed(tile_b), 16 << 20), vmem_budget))

    # ---- tiny batch-row / feature-col padding (no [B, 128] slab) ----
    def pad_to(x, rows, cols):
        x = x.astype(jnp.float32)
        r, c = rows - x.shape[0], cols - x.shape[1]
        return x if (r == 0 and c == 0) else jnp.pad(x, ((0, r), (0, c)))

    state_p = pad_to(state, b_pad, s_pad)
    action_p = pad_to(action, b_pad, a_pad)

    # ---- advisory cost estimate for XLA's scheduler ----
    flops = (2 * b_pad * (s_pad + a_pad) * h_pad
             + 2 * b_pad * h_pad * h_pad
             + 2 * b_pad * h_pad)
    bytes_accessed = (4 * b_pad * (s_pad + a_pad)                       # x
                      + wbytes * ((s_pad + a_pad) * h_pad + h_pad * h_pad)
                      + 4 * (3 * h_pad + 1)                             # b/w3
                      + 4 * b_pad)                                      # out
    cost = pl.CostEstimate(flops=int(flops), transcendentals=0,
                           bytes_accessed=int(bytes_accessed))

    def run(single_buffer_weights):
        def resident(shape):
            kwargs = {}
            if single_buffer_weights:
                # Constant index_map: the block never changes -> one buffer.
                kwargs["pipeline_mode"] = pl.Buffered(1)
            return pl.BlockSpec(shape, lambda i: (0, 0), **kwargs)

        in_specs = [
            pl.BlockSpec((tile_b, s_pad), lambda i: (i, 0)),   # state tile
            pl.BlockSpec((tile_b, a_pad), lambda i: (i, 0)),   # action tile
            resident((s_pad, h_pad)),                          # W1_state
            resident((a_pad, h_pad)),                          # W1_action
            resident((1, h_pad)),                              # b1
            resident((h_pad, h_pad)),                          # W2
            resident((1, h_pad)),                              # b2
            resident((1, h_pad)),                              # w3 row
            resident((1, 1)),                                  # b3
        ]
        return pl.pallas_call(
            _critic_kernel,
            out_shape=jax.ShapeDtypeStruct((b_pad, 1), jnp.float32),
            grid=(n_tiles,),
            in_specs=in_specs,
            # Narrow (tile_b, 1) output: byte-minimal; a lane-dense
            # (tile_b, 128) block would DMA 128x the output bytes.
            out_specs=pl.BlockSpec((tile_b, 1), lambda i: (i, 0)),
            compiler_params=pltpu.CompilerParams(
                dimension_semantics=("parallel",),
                vmem_limit_bytes=vmem_limit),
            cost_estimate=cost,
        )(state_p, action_p, w1s, w1a, b1, w2, b2, w3, b3)

    try:
        out = run(single_buffer_weights=True)
    except Exception:
        # pipeline_mode=pl.Buffered(1) unavailable in this JAX: fall back to
        # default double-buffered resident weights (correctness unaffected).
        out = run(single_buffer_weights=False)

    return out[:B]


# ---------------------------------------------------------------------------
# Parameters / references
# ---------------------------------------------------------------------------
def init_params(key, state_dim, action_dim, hidden_dim):
    """nn.Linear-style init (uniform +-1/sqrt(fan_in)); weights stored (in, out)."""
    ks = jax.random.split(key, 6)

    def lin(kw, kb, fan_in, fan_out):
        bound = 1.0 / jnp.sqrt(fan_in)
        w = jax.random.uniform(kw, (fan_in, fan_out), jnp.float32, -bound, bound)
        b = jax.random.uniform(kb, (fan_out,), jnp.float32, -bound, bound)
        return w, b

    w1, b1 = lin(ks[0], ks[1], state_dim + action_dim, hidden_dim)
    w2, b2 = lin(ks[2], ks[3], hidden_dim, hidden_dim)
    w3, b3 = lin(ks[4], ks[5], hidden_dim, 1)
    return (w1, b1, w2, b2, w3, b3)


def pack_params(params, state_dim, action_dim, hidden_dim,
                weight_dtype=jnp.float32):
    """Split W1 into state/action halves and zero-pad for the kernel.

    Feature dims pad to a multiple of 16 (bf16 sublane tile), hidden to a
    multiple of 128 (lane tile).  W1/W2 are stored in `weight_dtype`
    (float32 or bfloat16); biases and the layer-3 row stay float32.
    """
    w1, b1, w2, b2, w3, b3 = params
    s_pad = _round_up(state_dim, 16)
    a_pad = _round_up(action_dim, 16)
    h_pad = _round_up(hidden_dim, 128)

    w1s = (jnp.zeros((s_pad, h_pad), jnp.float32)
           .at[:state_dim, :hidden_dim].set(w1[:state_dim]))
    w1a = (jnp.zeros((a_pad, h_pad), jnp.float32)
           .at[:action_dim, :hidden_dim].set(w1[state_dim:]))
    w2p = (jnp.zeros((h_pad, h_pad), jnp.float32)
           .at[:hidden_dim, :hidden_dim].set(w2))
    b1p = jnp.zeros((1, h_pad), jnp.float32).at[:, :hidden_dim].set(b1)
    b2p = jnp.zeros((1, h_pad), jnp.float32).at[:, :hidden_dim].set(b2)
    w3p = jnp.zeros((1, h_pad), jnp.float32).at[:, :hidden_dim].set(w3[:, 0])
    b3p = b3.reshape(1, 1).astype(jnp.float32)
    return (w1s.astype(weight_dtype), w1a.astype(weight_dtype), b1p,
            w2p.astype(weight_dtype), b2p, w3p, b3p)


def critic_reference(state, action, params):
    """Pure-JAX float32 reference of the PyTorch forward pass."""
    w1, b1, w2, b2, w3, b3 = params
    x = jnp.concatenate([state, action], axis=1)
    h1 = jax.nn.relu(x @ w1 + b1)
    h2 = jax.nn.relu(h1 @ w2 + b2)
    return h2 @ w3 + b3


def critic_reference_matched(state, action, params, weight_dtype):
    """Reference applying the same weight/activation casts as the kernel."""
    w1, b1, w2, b2, w3, b3 = params
    x = jnp.concatenate([state, action], axis=1)
    h1 = jnp.dot(x.astype(weight_dtype), w1.astype(weight_dtype),
                 preferred_element_type=jnp.float32)
    h1 = jax.nn.relu(h1 + b1)
    h2 = jnp.dot(h1.astype(weight_dtype), w2.astype(weight_dtype),
                 preferred_element_type=jnp.float32)
    h2 = jax.nn.relu(h2 + b2)
    return jnp.sum(h2 * w3[:, 0], axis=-1, keepdims=True) + b3


# ---------------------------------------------------------------------------
# Self-test
# ---------------------------------------------------------------------------
if __name__ == "__main__":
    key = jax.random.PRNGKey(0)
    k_state, k_action, k_params = jax.random.split(key, 3)

    batch, state_dim, action_dim, hidden_dim = 8, 12, 4, 32

    state = jax.random.normal(k_state, (batch, state_dim), jnp.float32)
    action = jax.random.normal(k_action, (batch, action_dim), jnp.float32)
    params = init_params(k_params, state_dim, action_dim, hidden_dim)

    q_ref = critic_reference(state, action, params)

    # float32 weights: exact path.
    packed_f32 = pack_params(params, state_dim, action_dim, hidden_dim,
                             weight_dtype=jnp.float32)
    q_f32 = jax.block_until_ready(critic_forward(state, action, packed_f32))
    assert q_f32.shape == (batch, 1), q_f32.shape
    assert jnp.allclose(q_f32, q_ref, atol=1e-4, rtol=1e-4), (q_f32, q_ref)

    # bfloat16 weights (float32 accumulation): half the weight HBM/VMEM bytes
    # and native bf16 MXU rate.
    packed_bf16 = pack_params(params, state_dim, action_dim, hidden_dim,
                              weight_dtype=jnp.bfloat16)
    q_bf16 = jax.block_until_ready(critic_forward(state, action, packed_bf16))
    q_ref_bf16 = critic_reference_matched(state, action, params, jnp.bfloat16)
    assert q_bf16.shape == (batch, 1), q_bf16.shape
    assert jnp.allclose(q_bf16, q_ref_bf16, atol=2e-3, rtol=2e-3), (
        q_bf16, q_ref_bf16)
    assert jnp.allclose(q_bf16, q_ref, atol=1e-1, rtol=1e-1), (q_bf16, q_ref)

    print("KERNEL_OK")
</pallas_src>

<mosaic_0001>
module attributes {stable_mosaic.version = 11 : i64} {
  func.func @_critic_kernel(%arg0: i32, %arg1: memref<8x16xf32, #tpu.memory_space<vmem>>, %arg2: memref<8x16xf32, #tpu.memory_space<vmem>>, %arg3: memref<16x128xf32, #tpu.memory_space<vmem>>, %arg4: memref<16x128xf32, #tpu.memory_space<vmem>>, %arg5: memref<1x128xf32, #tpu.memory_space<vmem>>, %arg6: memref<128x128xf32, #tpu.memory_space<vmem>>, %arg7: memref<1x128xf32, #tpu.memory_space<vmem>>, %arg8: memref<1x128xf32, #tpu.memory_space<vmem>>, %arg9: memref<1x1xf32, #tpu.memory_space<vmem>>, %arg10: memref<8x1xf32, #tpu.memory_space<vmem>>) attributes {dimension_semantics = [#tpu.dimension_semantics<parallel>], iteration_bounds = array<i64: 1>, scalar_prefetch = 0 : i64, scratch_operands = 0 : i64, tpu.core_type = #tpu.core_type<tc>, window_params = [{transform_indices = @transform_0, window_bounds = array<i64: 8, 16>}, {transform_indices = @transform_1, window_bounds = array<i64: 8, 16>}, {pipeline_mode = #tpu.pipeline_mode<synchronous>, transform_indices = @transform_2, window_bounds = array<i64: 16, 128>}, {pipeline_mode = #tpu.pipeline_mode<synchronous>, transform_indices = @transform_3, window_bounds = array<i64: 16, 128>}, {pipeline_mode = #tpu.pipeline_mode<synchronous>, transform_indices = @transform_4, window_bounds = array<i64: 1, 128>}, {pipeline_mode = #tpu.pipeline_mode<synchronous>, transform_indices = @transform_5, window_bounds = array<i64: 128, 128>}, {pipeline_mode = #tpu.pipeline_mode<synchronous>, transform_indices = @transform_6, window_bounds = array<i64: 1, 128>}, {pipeline_mode = #tpu.pipeline_mode<synchronous>, transform_indices = @transform_7, window_bounds = array<i64: 1, 128>}, {pipeline_mode = #tpu.pipeline_mode<synchronous>, transform_indices = @transform_8, window_bounds = array<i64: 1, 1>}, {transform_indices = @transform_9, window_bounds = array<i64: 8, 1>}]} {
    %c0 = arith.constant 0 : index
    %c0_0 = arith.constant 0 : index
    %0 = vector.load %arg3[%c0, %c0_0] : memref<16x128xf32, #tpu.memory_space<vmem>>, vector<16x128xf32>
    %c0_1 = arith.constant 0 : index
    %c0_2 = arith.constant 0 : index
    %1 = vector.load %arg4[%c0_1, %c0_2] : memref<16x128xf32, #tpu.memory_space<vmem>>, vector<16x128xf32>
    %c0_3 = arith.constant 0 : index
    %c0_4 = arith.constant 0 : index
    %2 = vector.load %arg6[%c0_3, %c0_4] : memref<128x128xf32, #tpu.memory_space<vmem>>, vector<128x128xf32>
    %c0_5 = arith.constant 0 : index
    %c0_6 = arith.constant 0 : index
    %3 = vector.load %arg1[%c0_5, %c0_6] : memref<8x16xf32, #tpu.memory_space<vmem>>, vector<8x16xf32>
    %cst = arith.constant dense<0.000000e+00> : vector<8x128xf32>
    %4 = tpu.matmul %3, %0, %cst {dimension_numbers = #tpu.dot_dimension_numbers<[1], [0], [0], [1], [0, 0, 1, 1], [], []>} : vector<8x16xf32>, vector<16x128xf32>, vector<8x128xf32> -> vector<8x128xf32>
    %c0_7 = arith.constant 0 : index
    %c0_8 = arith.constant 0 : index
    %5 = vector.load %arg2[%c0_7, %c0_8] : memref<8x16xf32, #tpu.memory_space<vmem>>, vector<8x16xf32>
    %cst_9 = arith.constant dense<0.000000e+00> : vector<8x128xf32>
    %6 = tpu.matmul %5, %1, %cst_9 {dimension_numbers = #tpu.dot_dimension_numbers<[1], [0], [0], [1], [0, 0, 1, 1], [], []>} : vector<8x16xf32>, vector<16x128xf32>, vector<8x128xf32> -> vector<8x128xf32>
    %7 = arith.addf %4, %6 : vector<8x128xf32>
    %c0_10 = arith.constant 0 : index
    %c0_11 = arith.constant 0 : index
    %8 = vector.load %arg5[%c0_10, %c0_11] : memref<1x128xf32, #tpu.memory_space<vmem>>, vector<1x128xf32>
    %9 = vector.broadcast %8 : vector<1x128xf32> to vector<8x128xf32>
    %10 = arith.addf %7, %9 : vector<8x128xf32>
    %cst_12 = arith.constant 0.000000e+00 : f32
    %11 = vector.broadcast %cst_12 : f32 to vector<8x128xf32>
    %12 = arith.maximumf %10, %11 : vector<8x128xf32>
    %cst_13 = arith.constant dense<0.000000e+00> : vector<8x128xf32>
    %13 = tpu.matmul %12, %2, %cst_13 {dimension_numbers = #tpu.dot_dimension_numbers<[1], [0], [0], [1], [0, 0, 1, 1], [], []>} : vector<8x128xf32>, vector<128x128xf32>, vector<8x128xf32> -> vector<8x128xf32>
    %c0_14 = arith.constant 0 : index
    %c0_15 = arith.constant 0 : index
    %14 = vector.load %arg7[%c0_14, %c0_15] : memref<1x128xf32, #tpu.memory_space<vmem>>, vector<1x128xf32>
    %15 = vector.broadcast %14 : vector<1x128xf32> to vector<8x128xf32>
    %16 = arith.addf %13, %15 : vector<8x128xf32>
    %cst_16 = arith.constant 0.000000e+00 : f32
    %17 = vector.broadcast %cst_16 : f32 to vector<8x128xf32>
    %18 = arith.maximumf %16, %17 : vector<8x128xf32>
    %c0_17 = arith.constant 0 : index
    %c0_18 = arith.constant 0 : index
    %19 = vector.load %arg8[%c0_17, %c0_18] : memref<1x128xf32, #tpu.memory_space<vmem>>, vector<1x128xf32>
    %20 = vector.broadcast %19 : vector<1x128xf32> to vector<8x128xf32>
    %21 = arith.mulf %18, %20 : vector<8x128xf32>
    %cst_19 = arith.constant dense<0.000000e+00> : vector<8xf32>
    %22 = vector.multi_reduction <add>, %21, %cst_19 [1] : vector<8x128xf32> to vector<8xf32>
    %23 = vector.shape_cast %22 : vector<8xf32> to vector<8x1xf32>
    %c0_20 = arith.constant 0 : index
    %c0_21 = arith.constant 0 : index
    %24 = vector.load %arg9[%c0_20, %c0_21] : memref<1x1xf32, #tpu.memory_space<vmem>>, vector<1x1xf32>
    %25 = vector.broadcast %24 : vector<1x1xf32> to vector<8x1xf32>
    %26 = arith.addf %23, %25 : vector<8x1xf32>
    %c0_22 = arith.constant 0 : index
    %c0_23 = arith.constant 0 : index
    %27 = vector.load %arg10[%c0_22, %c0_23] : memref<8x1xf32, #tpu.memory_space<vmem>>, vector<8x1xf32>
    tpu.vector_store %arg10[%c0_22, %c0_23], %26 {strides = array<i32>} : memref<8x1xf32, #tpu.memory_space<vmem>>, vector<8x1xf32>,
    return
  }
  func.func @transform_0(%arg0: i32) -> (i32, i32) {
    %c0_i32 = arith.constant 0 : i32
    %c0_i32_0 = arith.constant 0 : i32
    return %arg0, %c0_i32 : i32, i32
  }
  func.func @transform_1(%arg0: i32) -> (i32, i32) {
    %c0_i32 = arith.constant 0 : i32
    %c0_i32_0 = arith.constant 0 : i32
    return %arg0, %c0_i32 : i32, i32
  }
  func.func @transform_2(%arg0: i32) -> (i32, i32) {
    %c0_i32 = arith.constant 0 : i32
    %c0_i32_0 = arith.constant 0 : i32
    %c0_i32_1 = arith.constant 0 : i32
    return %c0_i32, %c0_i32_0 : i32, i32
  }
  func.func @transform_3(%arg0: i32) -> (i32, i32) {
    %c0_i32 = arith.constant 0 : i32
    %c0_i32_0 = arith.constant 0 : i32
    %c0_i32_1 = arith.constant 0 : i32
    return %c0_i32, %c0_i32_0 : i32, i32
  }
  func.func @transform_4(%arg0: i32) -> (i32, i32) {
    %c0_i32 = arith.constant 0 : i32
    %c0_i32_0 = arith.constant 0 : i32
    %c0_i32_1 = arith.constant 0 : i32
    return %c0_i32, %c0_i32_0 : i32, i32
  }
  func.func @transform_5(%arg0: i32) -> (i32, i32) {
    %c0_i32 = arith.constant 0 : i32
    %c0_i32_0 = arith.constant 0 : i32
    %c0_i32_1 = arith.constant 0 : i32
    return %c0_i32, %c0_i32_0 : i32, i32
  }
  func.func @transform_6(%arg0: i32) -> (i32, i32) {
    %c0_i32 = arith.constant 0 : i32
    %c0_i32_0 = arith.constant 0 : i32
    %c0_i32_1 = arith.constant 0 : i32
    return %c0_i32, %c0_i32_0 : i32, i32
  }
  func.func @transform_7(%arg0: i32) -> (i32, i32) {
    %c0_i32 = arith.constant 0 : i32
    %c0_i32_0 = arith.constant 0 : i32
    %c0_i32_1 = arith.constant 0 : i32
    return %c0_i32, %c0_i32_0 : i32, i32
  }
  func.func @transform_8(%arg0: i32) -> (i32, i32) {
    %c0_i32 = arith.constant 0 : i32
    %c0_i32_0 = arith.constant 0 : i32
    %c0_i32_1 = arith.constant 0 : i32
    return %c0_i32, %c0_i32_0 : i32, i32
  }
  func.func @transform_9(%arg0: i32) -> (i32, i32) {
    %c0_i32 = arith.constant 0 : i32
    %c0_i32_0 = arith.constant 0 : i32
    return %arg0, %c0_i32 : i32, i32
  }
}

module attributes {stable_mosaic.version = 11 : i64} {
  func.func @_critic_kernel(%arg0: i32, %arg1: memref<8x16xf32, #tpu.memory_space<vmem>>, %arg2: memref<8x16xf32, #tpu.memory_space<vmem>>, %arg3: memref<16x128xf32, #tpu.memory_space<vmem>>, %arg4: memref<16x128xf32, #tpu.memory_space<vmem>>, %arg5: memref<1x128xf32, #tpu.memory_space<vmem>>, %arg6: memref<128x128xf32, #tpu.memory_space<vmem>>, %arg7: memref<1x128xf32, #tpu.memory_space<vmem>>, %arg8: memref<1x128xf32, #tpu.memory_space<vmem>>, %arg9: memref<1x1xf32, #tpu.memory_space<vmem>>, %arg10: memref<8x1xf32, #tpu.memory_space<vmem>>) attributes {dimension_semantics = [#tpu.dimension_semantics<parallel>], iteration_bounds = array<i64: 1>, scalar_prefetch = 0 : i64, scratch_operands = 0 : i64, tpu.core_type = #tpu.core_type<tc>, window_params = [{transform_indices = @transform_0, window_bounds = array<i64: 8, 16>}, {transform_indices = @transform_1, window_bounds = array<i64: 8, 16>}, {pipeline_mode = #tpu.pipeline_mode<synchronous>, transform_indices = @transform_2, window_bounds = array<i64: 16, 128>}, {pipeline_mode = #tpu.pipeline_mode<synchronous>, transform_indices = @transform_3, window_bounds = array<i64: 16, 128>}, {pipeline_mode = #tpu.pipeline_mode<synchronous>, transform_indices = @transform_4, window_bounds = array<i64: 1, 128>}, {pipeline_mode = #tpu.pipeline_mode<synchronous>, transform_indices = @transform_5, window_bounds = array<i64: 128, 128>}, {pipeline_mode = #tpu.pipeline_mode<synchronous>, transform_indices = @transform_6, window_bounds = array<i64: 1, 128>}, {pipeline_mode = #tpu.pipeline_mode<synchronous>, transform_indices = @transform_7, window_bounds = array<i64: 1, 128>}, {pipeline_mode = #tpu.pipeline_mode<synchronous>, transform_indices = @transform_8, window_bounds = array<i64: 1, 1>}, {transform_indices = @transform_9, window_bounds = array<i64: 8, 1>}]} {
    %c0 = arith.constant 0 : index
    %c0_0 = arith.constant 0 : index
    %0 = vector.load %arg3[%c0, %c0_0] : memref<16x128xf32, #tpu.memory_space<vmem>>, vector<16x128xf32>
    %c0_1 = arith.constant 0 : index
    %c0_2 = arith.constant 0 : index
    %1 = vector.load %arg4[%c0_1, %c0_2] : memref<16x128xf32, #tpu.memory_space<vmem>>, vector<16x128xf32>
    %c0_3 = arith.constant 0 : index
    %c0_4 = arith.constant 0 : index
    %2 = vector.load %arg6[%c0_3, %c0_4] : memref<128x128xf32, #tpu.memory_space<vmem>>, vector<128x128xf32>
    %c0_5 = arith.constant 0 : index
    %c0_6 = arith.constant 0 : index
    %3 = vector.load %arg1[%c0_5, %c0_6] : memref<8x16xf32, #tpu.memory_space<vmem>>, vector<8x16xf32>
    %cst = arith.constant dense<0.000000e+00> : vector<8x128xf32>
    %4 = tpu.matmul %3, %0, %cst {dimension_numbers = #tpu.dot_dimension_numbers<[1], [0], [0], [1], [0, 0, 1, 1], [], []>} : vector<8x16xf32>, vector<16x128xf32>, vector<8x128xf32> -> vector<8x128xf32>
    %c0_7 = arith.constant 0 : index
    %c0_8 = arith.constant 0 : index
    %5 = vector.load %arg2[%c0_7, %c0_8] : memref<8x16xf32, #tpu.memory_space<vmem>>, vector<8x16xf32>
    %cst_9 = arith.constant dense<0.000000e+00> : vector<8x128xf32>
    %6 = tpu.matmul %5, %1, %cst_9 {dimension_numbers = #tpu.dot_dimension_numbers<[1], [0], [0], [1], [0, 0, 1, 1], [], []>} : vector<8x16xf32>, vector<16x128xf32>, vector<8x128xf32> -> vector<8x128xf32>
    %7 = arith.addf %4, %6 : vector<8x128xf32>
    %c0_10 = arith.constant 0 : index
    %c0_11 = arith.constant 0 : index
    %8 = vector.load %arg5[%c0_10, %c0_11] : memref<1x128xf32, #tpu.memory_space<vmem>>, vector<1x128xf32>
    %9 = vector.broadcast %8 : vector<1x128xf32> to vector<8x128xf32>
    %10 = arith.addf %7, %9 : vector<8x128xf32>
    %cst_12 = arith.constant 0.000000e+00 : f32
    %11 = vector.broadcast %cst_12 : f32 to vector<8x128xf32>
    %12 = arith.maximumf %10, %11 : vector<8x128xf32>
    %cst_13 = arith.constant dense<0.000000e+00> : vector<8x128xf32>
    %13 = tpu.matmul %12, %2, %cst_13 {dimension_numbers = #tpu.dot_dimension_numbers<[1], [0], [0], [1], [0, 0, 1, 1], [], []>} : vector<8x128xf32>, vector<128x128xf32>, vector<8x128xf32> -> vector<8x128xf32>
    %c0_14 = arith.constant 0 : index
    %c0_15 = arith.constant 0 : index
    %14 = vector.load %arg7[%c0_14, %c0_15] : memref<1x128xf32, #tpu.memory_space<vmem>>, vector<1x128xf32>
    %15 = vector.broadcast %14 : vector<1x128xf32> to vector<8x128xf32>
    %16 = arith.addf %13, %15 : vector<8x128xf32>
    %cst_16 = arith.constant 0.000000e+00 : f32
    %17 = vector.broadcast %cst_16 : f32 to vector<8x128xf32>
    %18 = arith.maximumf %16, %17 : vector<8x128xf32>
    %c0_17 = arith.constant 0 : index
    %c0_18 = arith.constant 0 : index
    %19 = vector.load %arg8[%c0_17, %c0_18] : memref<1x128xf32, #tpu.memory_space<vmem>>, vector<1x128xf32>
    %20 = vector.broadcast %19 : vector<1x128xf32> to vector<8x128xf32>
    %21 = arith.mulf %18, %20 : vector<8x128xf32>
    %cst_19 = arith.constant dense<0.000000e+00> : vector<8xf32>
    %22 = vector.multi_reduction <add>, %21, %cst_19 [1] : vector<8x128xf32> to vector<8xf32>
    %23 = vector.shape_cast %22 : vector<8xf32> to vector<8x1xf32>
    %c0_20 = arith.constant 0 : index
    %c0_21 = arith.constant 0 : index
    %24 = vector.load %arg9[%c0_20, %c0_21] : memref<1x1xf32, #tpu.memory_space<vmem>>, vector<1x1xf32>
    %25 = vector.broadcast %24 : vector<1x1xf32> to vector<8x1xf32>
    %26 = arith.addf %23, %25 : vector<8x1xf32>
    %c0_22 = arith.constant 0 : index
    %c0_23 = arith.constant 0 : index
    %27 = vector.load %arg10[%c0_22, %c0_23] : memref<8x1xf32, #tpu.memory_space<vmem>>, vector<8x1xf32>
    tpu.vector_store %arg10[%c0_22, %c0_23], %26 {strides = array<i32>} : memref<8x1xf32, #tpu.memory_space<vmem>>, vector<8x1xf32>,
    return
  }
  func.func @transform_0(%arg0: i32) -> (i32, i32) {
    %c0_i32 = arith.constant 0 : i32
    %c0_i32_0 = arith.constant 0 : i32
    return %arg0, %c0_i32 : i32, i32
  }
  func.func @transform_1(%arg0: i32) -> (i32, i32) {
    %c0_i32 = arith.constant 0 : i32
    %c0_i32_0 = arith.constant 0 : i32
    return %arg0, %c0_i32 : i32, i32
  }
  func.func @transform_2(%arg0: i32) -> (i32, i32) {
    %c0_i32 = arith.constant 0 : i32
    %c0_i32_0 = arith.constant 0 : i32
    %c0_i32_1 = arith.constant 0 : i32
    return %c0_i32, %c0_i32_0 : i32, i32
  }
  func.func @transform_3(%arg0: i32) -> (i32, i32) {
    %c0_i32 = arith.constant 0 : i32
    %c0_i32_0 = arith.constant 0 : i32
    %c0_i32_1 = arith.constant 0 : i32
    return %c0_i32, %c0_i32_0 : i32, i32
  }
  func.func @transform_4(%arg0: i32) -> (i32, i32) {
    %c0_i32 = arith.constant 0 : i32
    %c0_i32_0 = arith.constant 0 : i32
    %c0_i32_1 = arith.constant 0 : i32
    return %c0_i32, %c0_i32_0 : i32, i32
  }
  func.func @transform_5(%arg0: i32) -> (i32, i32) {
    %c0_i32 = arith.constant 0 : i32
    %c0_i32_0 = arith.constant 0 : i32
    %c0_i32_1 = arith.constant 0 : i32
    return %c0_i32, %c0_i32_0 : i32, i32
  }
  func.func @transform_6(%arg0: i32) -> (i32, i32) {
    %c0_i32 = arith.constant 0 : i32
    %c0_i32_0 = arith.constant 0 : i32
    %c0_i32_1 = arith.constant 0 : i32
    return %c0_i32, %c0_i32_0 : i32, i32
  }
  func.func @transform_7(%arg0: i32) -> (i32, i32) {
    %c0_i32 = arith.constant 0 : i32
    %c0_i32_0 = arith.constant 0 : i32
    %c0_i32_1 = arith.constant 0 : i32
    return %c0_i32, %c0_i32_0 : i32, i32
  }
  func.func @transform_8(%arg0: i32) -> (i32, i32) {
    %c0_i32 = arith.constant 0 : i32
    %c0_i32_0 = arith.constant 0 : i32
    %c0_i32_1 = arith.constant 0 : i32
    return %c0_i32, %c0_i32_0 : i32, i32
  }
  func.func @transform_9(%arg0: i32) -> (i32, i32) {
    %c0_i32 = arith.constant 0 : i32
    %c0_i32_0 = arith.constant 0 : i32
    return %arg0, %c0_i32 : i32, i32
  }
}

</mosaic_0001>

<bundles_post_ra>
// kernel: tpu_custom_call.1
= control target key start
LH: loop header
LB: loop body
LE: loop exit
PB: predicated region body
PF: predicated region fallthrough
CT: control target
= control target key end

     0   :  { %s700_s0 = inlined_call_operand.hbm [shape: f32[8,16], index: 0, kind: input, shape index: {}]   ;;  %s701_s1 = inlined_call_operand.hbm [shape: f32[8,16], index: 1, kind: input, shape index: {}]   ;;  %s702_s2 = inlined_call_operand.hbm [shape: f32[16,128], index: 2, kind: input, shape index: {}]   ;;  %s703_s3 = inlined_call_operand.hbm [shape: f32[16,128], index: 3, kind: input, shape index: {}]   ;;  %s704_s4 = inlined_call_operand.vmem [shape: f32[1,128], index: 4, kind: input, shape index: {}]   ;;  %s705_s5 = inlined_call_operand.hbm [shape: f32[128,128], index: 5, kind: input, shape index: {}]   ;;  %s706_s6 = inlined_call_operand.vmem [shape: f32[1,128], index: 6, kind: input, shape index: {}]   ;;  %s707_s7 = inlined_call_operand.vmem [shape: f32[1,128], index: 7, kind: input, shape index: {}]   ;;  %s708_s8 = inlined_call_operand.<no memory space> [shape: f32[1,1], index: 8, kind: input, shape index: {}]   ;;  %s709_s9 = inlined_call_operand.vmem [shape: f32[8,1], index: 9, kind: output, shape index: {}]  }
   0x1   :  { %v14_v0 = vstv %s708_s8 }
   0x2   :  { %15 = vst [vmem:[#allocation2] sm:$0x1] %v14_v0 }
   0x3   :  { %16 = vsyncpa [#allocation4], 0 }
   0x4   :  { %17 = vsyncpa [#allocation6], 0 }
   0x5   :  { %18 = vsyncpa [#allocation9], 0  ;;  %s574_s11 = smov [#allocation5]  }
   0x6   :  { %s35_s12 = sshll.u32 %s574_s11, 4  ;;  %s36_s12 = int_to_ptr.vmem [resolvable:$true] %s35_s12 }
   0x7   :  { %s476_s13 = scalar_lea.vmem %s36_s12, 128  ;;  %p481_p1 = scmp.lt.s32.totalorder %s36_s12, %s36_s12 }
   0x8   :  { %p477_p0 = scmp.ne.s32.totalorder %s36_s12, %s476_s13  ;;  %p482_p2 = scmp.lt.s32.totalorder %s476_s13, %s476_s13 }
   0xa   :  { %p483_p3 = por %p482_p2, %p481_p1 }
   0xc   :  { %p484_p4 = pnand %p483_p3, %p477_p0 }
   0xe   :  { %487 = shalt.err (!%p484_p4)
}
   0xf   :  { %38 = dma.hbm_to_vmem [thread:$0]  %s701_s1, 128, %s36_s12, [#allocation6]  }
  0x10   :  { %s575_s16 = smov [#allocation8]   ;;  %s576_s17 = smov [#allocation3]  }
  0x11   :  { %s56_s8 = sshll.u32 %s575_s16, 4  ;;  %s25_s18 = sshll.u32 %s576_s17, 4  ;;  %s57_s8 = int_to_ptr.vmem [resolvable:$true] %s56_s8  ;;  %s26_s18 = int_to_ptr.vmem [resolvable:$true] %s25_s18 }
  0x12   :  { %s496_s19 = scalar_lea.vmem %s57_s8, 256  ;;  %p501_p6 = scmp.lt.s32.totalorder %s57_s8, %s57_s8 }
  0x13   :  { %p497_p5 = scmp.ne.s32.totalorder %s57_s8, %s496_s19  ;;  %p502_p7 = scmp.lt.s32.totalorder %s496_s19, %s496_s19 }
  0x15   :  { %p503_p8 = por %p502_p7, %p501_p6 }
  0x17   :  { %p504_p9 = pnand %p503_p8, %p497_p5 }
  0x19   :  { %507 = shalt.err (!%p504_p9)
}
  0x1a   :  { %s577_s20 = smov 128   ;;  %s578_s21 = smov 8  }
  0x1b   :  { %62 = dma.hbm_to_vmem [thread:$0]  %s703_s3, 256, %s57_s8, [#allocation9], %s577_s20, %s577_s20, %s578_s21  }
  0x1c   :  { %s516_s1 = scalar_lea.vmem %s26_s18, 128  ;;  %p521_p11 = scmp.lt.s32.totalorder %s26_s18, %s26_s18 }
  0x1d   :  { %p517_p10 = scmp.ne.s32.totalorder %s26_s18, %s516_s1  ;;  %p522_p12 = scmp.lt.s32.totalorder %s516_s1, %s516_s1 }
  0x1f   :  { %p523_p13 = por %p522_p12, %p521_p11 }
  0x21   :  { %p524_p0 = pnand %p523_p13, %p517_p10 }
  0x23   :  { %527 = shalt.err (!%p524_p0)
}
  0x24   :  { %28 = dma.hbm_to_vmem [thread:$0]  %s700_s0, 128, %s26_s18, [#allocation4]  }
  0x25   :  { %s579_s26 = smov [#allocation7]   ;;  %s580_s28 = smov [#allocation10]  }
  0x26   :  { %s44_s27 = sshll.u32 %s579_s26, 4  ;;  %s70_s29 = sshll.u32 %s580_s28, 4  ;;  %s45_s27 = int_to_ptr.vmem [resolvable:$true] %s44_s27  ;;  %s71_s29 = int_to_ptr.vmem [resolvable:$true] %s70_s29 }
  0x27   :  { %s536_s30 = scalar_lea.vmem %s45_s27, 256  ;;  %p541_p2 = scmp.lt.s32.totalorder %s45_s27, %s45_s27 }
  0x28   :  { %p537_p1 = scmp.ne.s32.totalorder %s45_s27, %s536_s30  ;;  %p542_p3 = scmp.lt.s32.totalorder %s536_s30, %s536_s30 }
  0x2a   :  { %p543_p4 = por %p542_p3, %p541_p2 }
  0x2c   :  { %p544_p5 = pnand %p543_p4, %p537_p1 }
  0x2e   :  { %547 = shalt.err (!%p544_p5)
}
  0x2f   :  { %50 = dma.hbm_to_vmem [thread:$0]  %s702_s2, 256, %s45_s27, [#allocation6], %s577_s20, %s577_s20, %s578_s21  }
  0x30   :  { %s556_s0 = scalar_lea.vmem %s71_s29, 2048  ;;  %p561_p7 = scmp.lt.s32.totalorder %s71_s29, %s71_s29 }
  0x31   :  { %p557_p6 = scmp.ne.s32.totalorder %s71_s29, %s556_s0  ;;  %p562_p8 = scmp.lt.s32.totalorder %s556_s0, %s556_s0 }
  0x33   :  { %p563_p9 = por %p562_p8, %p561_p7 }
  0x35   :  { %p564_p10 = pnand %p563_p9, %p557_p6 }
  0x37   :  { %567 = shalt.err (!%p564_p10)
}
  0x38   :  { %76 = dma.hbm_to_vmem [thread:$0]  %s705_s5, 2048, %s71_s29, [#allocation9], %s577_s20, %s577_s20, %s578_s21  }
  0x39   :  { %568 = dma.done.wait [#allocation4], 128  }
  0x3a   :  { %569 = vsyncadd [#allocation4], 4294967168 }
  0x3b   :  { %570 = dma.done.wait [#allocation6], 384  }
  0x3c   :  { %571 = vsyncadd [#allocation6], 4294966912 }
  0x3d   :  { %572 = dma.done.wait [#allocation9], 2304  }
  0x3e   :  { %573 = vsyncadd [#allocation9], 4294964992  ;;  %v581_v1 = vmov 0.0   ;;  %vm582_vm0 = vmmov 0   ;;  %v101_v2 = vld [vmem:[#allocation8 + $0x8] sm:$0xff]  ;;  %v100_v3 = vld [vmem:[#allocation8] sm:$0xff] }
  0x3f   :  { %410 = vmatprep.subr.mxu1 %v581_v1  ;;  %414 = vmatprep.mubr.msk.f32.mxu1 %vm582_vm0, %v581_v1  ;;  %v119_v4 = vld [vmem:[#allocation5] sm:$0xff]  ;;  %vm120_vm1 = vcmask 130048   ;;  %v99_v5 = vld [vmem:[#allocation7 + $0x8] sm:$0xff]  ;;  %v98_v7 = vld [vmem:[#allocation7] sm:$0xff]  ;;  %vm372_vm2 = vcmask 7168  }
  0x40   :  { %424 = vmatprep.subr.mxu0 %v581_v1  ;;  %456 = vmatprep.mubr.msk.f32.mxu0 %vm582_vm0, %v581_v1  ;;  %v117_v6 = vld [vmem:[#allocation10 + $0x78] sm:$0xff]  ;;  %v116_v8 = vld [vmem:[#allocation10 + $0x70] sm:$0xff]  ;;  %v115_v10 = vld [vmem:[#allocation10 + $0x68] sm:$0xff] }
  0x41   :  { %411 = vmatpush3.msra.mxu1 %v101_v2  ;;  %425 = vmatpush3.msra.mxu0 %v117_v6  ;;  %v118_v9 = vld [vmem:[#allocation3] sm:$0xff]  ;;  %v114_v11 = vld [vmem:[#allocation10 + $0x60] sm:$0xff]  ;;  %v113_v12 = vld [vmem:[#allocation10 + $0x58] sm:$0xff] }
  0x42   :  { %412 = vmatprep.subr.mxu1 %v581_v1  ;;  %426 = vmatprep.subr.mxu0 %v581_v1  ;;  %v112_v13 = vld [vmem:[#allocation10 + $0x50] sm:$0xff]  ;;  %v111_v14 = vld [vmem:[#allocation10 + $0x48] sm:$0xff]  ;;  %v110_v15 = vld [vmem:[#allocation10 + $0x40] sm:$0xff] }
  0x43   :  { %413 = vmatpush3.msra.mxu1 %v100_v3  ;;  %427 = vmatpush3.msra.mxu0 %v116_v8  ;;  %v109_v16 = vld [vmem:[#allocation10 + $0x38] sm:$0xff]  ;;  %v108_v17 = vld [vmem:[#allocation10 + $0x30] sm:$0xff]  ;;  %v107_v18 = vld [vmem:[#allocation10 + $0x28] sm:$0xff] }
  0x44   :  { %415 = vmatmul.mubr.msk.f32.vlgmr.msra.gmra.mxu1 %vm120_vm1, %v119_v4  ;;  %417 = vmatprep.subr.mxu1 %v581_v1  ;;  %v106_v19 = vld [vmem:[#allocation10 + $0x20] sm:$0xff]  ;;  %v105_v20 = vld [vmem:[#allocation10 + $0x18] sm:$0xff]  ;;  %v104_v21 = vld [vmem:[#allocation10 + $0x10] sm:$0xff] }
  0x45   :  { %418 = vmatpush3.msra.mxu1 %v99_v5  ;;  %421 = vmatprep.mubr.msk.f32.mxu1 %vm582_vm0, %v581_v1  ;;  %v103_v22 = vld [vmem:[#allocation10 + $0x8] sm:$0xff]  ;;  %v102_v23 = vld [vmem:[#allocation10] sm:$0xff] }
  0x46   :  { %419 = vmatprep.subr.mxu1 %v581_v1  ;;  %428 = vmatprep.subr.mxu0 %v581_v1  ;;  %v383_v27 = vld [vmem:[%s704_s4] ss:$0 sm:$0xff] }
  0x47   :  { %420 = vmatpush3.msra.mxu1 %v98_v7  ;;  %429 = vmatpush3.msra.mxu0 %v115_v10  ;;  %v384_v32 = vld [vmem:[%s706_s6] ss:$0 sm:$0xff] }
  0x48   :  { %422 = vmatmul.mubr.msk.f32.vlgmr.msra.gmra.mxu1 %vm120_vm1, %v118_v9  ;;  %430 = vmatprep.subr.mxu0 %v581_v1  ;;  %v385_v36 = vld [vmem:[%s707_s7] ss:$0 sm:$0xff] }
  0x49   :  { %431 = vmatpush3.msra.mxu0 %v114_v11  ;;  %v386_v39 = vld [vmem:[#allocation2] ss:$0 sm:$0xff] }
  0x4a   :  { %432 = vmatprep.subr.mxu0 %v581_v1 }
  0x4b   :  { %433 = vmatpush3.msra.mxu0 %v113_v12 }
  0x4c   :  { %434 = vmatprep.subr.mxu0 %v581_v1 }
  0x4d   :  { %435 = vmatpush3.msra.mxu0 %v112_v13 }
  0x4e   :  { %436 = vmatprep.subr.mxu0 %v581_v1 }
  0x4f   :  { %437 = vmatpush3.msra.mxu0 %v111_v14 }
  0x50   :  { %438 = vmatprep.subr.mxu0 %v581_v1 }
  0x51   :  { %439 = vmatpush3.msra.mxu0 %v110_v15 }
  0x52   :  { %440 = vmatprep.subr.mxu0 %v581_v1 }
  0x53   :  { %441 = vmatpush3.msra.mxu0 %v109_v16 }
  0x54   :  { %442 = vmatprep.subr.mxu0 %v581_v1 }
  0x55   :  { %443 = vmatpush3.msra.mxu0 %v108_v17 }
  0x56   :  { %444 = vmatprep.subr.mxu0 %v581_v1 }
  0x57   :  { %445 = vmatpush3.msra.mxu0 %v107_v18 }
  0x58   :  { %446 = vmatprep.subr.mxu0 %v581_v1 }
  0x59   :  { %447 = vmatpush3.msra.mxu0 %v106_v19 }
  0x5a   :  { %448 = vmatprep.subr.mxu0 %v581_v1 }
  0x5b   :  { %449 = vmatpush3.msra.mxu0 %v105_v20 }
  0x5c   :  { %450 = vmatprep.subr.mxu0 %v581_v1 }
  0x5d   :  { %451 = vmatpush3.msra.mxu0 %v104_v21 }
  0x5e   :  { %452 = vmatprep.subr.mxu0 %v581_v1 }
  0x5f   :  { %453 = vmatpush3.msra.mxu0 %v103_v22 }
  0x60   :  { %454 = vmatprep.subr.mxu0 %v581_v1 }
  0x61   :  { %455 = vmatpush3.msra.mxu0 %v102_v23 }
 0x104   :  { %v190_v24 = vpop.f32.mrf.mxu1 }
 0x106   :  { %v416_v25 = vpop.f32.mrf.mxu1 }
 0x108   :  { %v263_v26 = vpop.f32.mrf.mxu1 }
 0x109   :  { %v264_v28 = vadd.f32 %v263_v26, %v190_v24 }
 0x10a   :  { %v423_v29 = vpop.f32.mrf.mxu1 }
 0x10b   :  { %v274_v30 = vadd.f32 %v383_v27, %v264_v28 }
 0x10d   :  { %v275_v31 = vmax.f32 %v274_v30, 0.0 }
 0x10f   :  { %457 = vmatmul.mubr.f32.vlgmr.msra.gmra.mxu0 %v275_v31 }
 0x1cf   :  { %v349_v33 = vpop.f32.mrf.mxu0 }
 0x1d0   :  { %v350_v34 = vadd.f32 %v384_v32, %v349_v33 }
 0x1d1   :  { %v458_v35 = vpop.f32.mrf.mxu0 }
 0x1d2   :  { %v353_v37 = vmax.f32 %v350_v34, 0.0 }
 0x1d4   :  { %v361_v38 = vmul.f32 %v385_v36, %v353_v37 }
 0x1d6   :  { %362 = vadd.xlane.f32.xlu0 %v361_v38 }
 0x25f   :  { %v363_v40 = vpop.xlane.xlu0 %362 }
 0x260   :  { %v371_v41 = vadd.f32 %v386_v39, %v363_v40 }
 0x262   :  { %373 = vst.msk [vmem:[%s709_s9] sm:$0xff] %vm372_vm2, %v371_v41 }
 0x263   :  { %378 = vsyncpa [#allocation4], 1 }
 0x264   :  { %379 = vsyncpa [#allocation6], 1 }
 0x265   :  { %380 = vsyncpa [#allocation9], 1 }

// kernel: tpu_custom_call.1
= control target key start
LH: loop header
LB: loop body
LE: loop exit
PB: predicated region body
PF: predicated region fallthrough
CT: control target
= control target key end

     0   :  { %s700_s0 = inlined_call_operand.hbm [shape: f32[8,16], index: 0, kind: input, shape index: {}]   ;;  %s701_s1 = inlined_call_operand.hbm [shape: f32[8,16], index: 1, kind: input, shape index: {}]   ;;  %s702_s2 = inlined_call_operand.hbm [shape: f32[16,128], index: 2, kind: input, shape index: {}]   ;;  %s703_s3 = inlined_call_operand.hbm [shape: f32[16,128], index: 3, kind: input, shape index: {}]   ;;  %s704_s4 = inlined_call_operand.vmem [shape: f32[1,128], index: 4, kind: input, shape index: {}]   ;;  %s705_s5 = inlined_call_operand.hbm [shape: f32[128,128], index: 5, kind: input, shape index: {}]   ;;  %s706_s6 = inlined_call_operand.vmem [shape: f32[1,128], index: 6, kind: input, shape index: {}]   ;;  %s707_s7 = inlined_call_operand.vmem [shape: f32[1,128], index: 7, kind: input, shape index: {}]   ;;  %s708_s8 = inlined_call_operand.<no memory space> [shape: f32[1,1], index: 8, kind: input, shape index: {}]   ;;  %s709_s9 = inlined_call_operand.vmem [shape: f32[8,1], index: 9, kind: output, shape index: {}]  }
   0x1   :  { %v14_v0 = vstv %s708_s8 }
   0x2   :  { %15 = vst [vmem:[#allocation2] sm:$0x1] %v14_v0 }
   0x3   :  { %16 = vsyncpa [#allocation4], 0 }
   0x4   :  { %17 = vsyncpa [#allocation6], 0 }
   0x5   :  { %18 = vsyncpa [#allocation9], 0  ;;  %s574_s11 = smov [#allocation5]  }
   0x6   :  { %s35_s12 = sshll.u32 %s574_s11, 4  ;;  %s36_s12 = int_to_ptr.vmem [resolvable:$true] %s35_s12 }
   0x7   :  { %s476_s13 = scalar_lea.vmem %s36_s12, 128  ;;  %p481_p1 = scmp.lt.s32.totalorder %s36_s12, %s36_s12 }
   0x8   :  { %p477_p0 = scmp.ne.s32.totalorder %s36_s12, %s476_s13  ;;  %p482_p2 = scmp.lt.s32.totalorder %s476_s13, %s476_s13 }
   0xa   :  { %p483_p3 = por %p482_p2, %p481_p1 }
   0xc   :  { %p484_p4 = pnand %p483_p3, %p477_p0 }
   0xe   :  { %487 = shalt.err (!%p484_p4)
}
   0xf   :  { %38 = dma.hbm_to_vmem [thread:$0]  %s701_s1, 128, %s36_s12, [#allocation6]  }
  0x10   :  { %s575_s16 = smov [#allocation8]   ;;  %s576_s17 = smov [#allocation3]  }
  0x11   :  { %s56_s8 = sshll.u32 %s575_s16, 4  ;;  %s25_s18 = sshll.u32 %s576_s17, 4  ;;  %s57_s8 = int_to_ptr.vmem [resolvable:$true] %s56_s8  ;;  %s26_s18 = int_to_ptr.vmem [resolvable:$true] %s25_s18 }
  0x12   :  { %s496_s19 = scalar_lea.vmem %s57_s8, 256  ;;  %p501_p6 = scmp.lt.s32.totalorder %s57_s8, %s57_s8 }
  0x13   :  { %p497_p5 = scmp.ne.s32.totalorder %s57_s8, %s496_s19  ;;  %p502_p7 = scmp.lt.s32.totalorder %s496_s19, %s496_s19 }
  0x15   :  { %p503_p8 = por %p502_p7, %p501_p6 }
  0x17   :  { %p504_p9 = pnand %p503_p8, %p497_p5 }
  0x19   :  { %507 = shalt.err (!%p504_p9)
}
  0x1a   :  { %s577_s20 = smov 128   ;;  %s578_s21 = smov 8  }
  0x1b   :  { %62 = dma.hbm_to_vmem [thread:$0]  %s703_s3, 256, %s57_s8, [#allocation9], %s577_s20, %s577_s20, %s578_s21  }
  0x1c   :  { %s516_s1 = scalar_lea.vmem %s26_s18, 128  ;;  %p521_p11 = scmp.lt.s32.totalorder %s26_s18, %s26_s18 }
  0x1d   :  { %p517_p10 = scmp.ne.s32.totalorder %s26_s18, %s516_s1  ;;  %p522_p12 = scmp.lt.s32.totalorder %s516_s1, %s516_s1 }
  0x1f   :  { %p523_p13 = por %p522_p12, %p521_p11 }
  0x21   :  { %p524_p0 = pnand %p523_p13, %p517_p10 }
  0x23   :  { %527 = shalt.err (!%p524_p0)
}
  0x24   :  { %28 = dma.hbm_to_vmem [thread:$0]  %s700_s0, 128, %s26_s18, [#allocation4]  }
  0x25   :  { %s579_s26 = smov [#allocation7]   ;;  %s580_s28 = smov [#allocation10]  }
  0x26   :  { %s44_s27 = sshll.u32 %s579_s26, 4  ;;  %s70_s29 = sshll.u32 %s580_s28, 4  ;;  %s45_s27 = int_to_ptr.vmem [resolvable:$true] %s44_s27  ;;  %s71_s29 = int_to_ptr.vmem [resolvable:$true] %s70_s29 }
  0x27   :  { %s536_s30 = scalar_lea.vmem %s45_s27, 256  ;;  %p541_p2 = scmp.lt.s32.totalorder %s45_s27, %s45_s27 }
  0x28   :  { %p537_p1 = scmp.ne.s32.totalorder %s45_s27, %s536_s30  ;;  %p542_p3 = scmp.lt.s32.totalorder %s536_s30, %s536_s30 }
  0x2a   :  { %p543_p4 = por %p542_p3, %p541_p2 }
  0x2c   :  { %p544_p5 = pnand %p543_p4, %p537_p1 }
  0x2e   :  { %547 = shalt.err (!%p544_p5)
}
  0x2f   :  { %50 = dma.hbm_to_vmem [thread:$0]  %s702_s2, 256, %s45_s27, [#allocation6], %s577_s20, %s577_s20, %s578_s21  }
  0x30   :  { %s556_s0 = scalar_lea.vmem %s71_s29, 2048  ;;  %p561_p7 = scmp.lt.s32.totalorder %s71_s29, %s71_s29 }
  0x31   :  { %p557_p6 = scmp.ne.s32.totalorder %s71_s29, %s556_s0  ;;  %p562_p8 = scmp.lt.s32.totalorder %s556_s0, %s556_s0 }
  0x33   :  { %p563_p9 = por %p562_p8, %p561_p7 }
  0x35   :  { %p564_p10 = pnand %p563_p9, %p557_p6 }
  0x37   :  { %567 = shalt.err (!%p564_p10)
}
  0x38   :  { %76 = dma.hbm_to_vmem [thread:$0]  %s705_s5, 2048, %s71_s29, [#allocation9], %s577_s20, %s577_s20, %s578_s21  }
  0x39   :  { %568 = dma.done.wait [#allocation4], 128  }
  0x3a   :  { %569 = vsyncadd [#allocation4], 4294967168 }
  0x3b   :  { %570 = dma.done.wait [#allocation6], 384  }
  0x3c   :  { %571 = vsyncadd [#allocation6], 4294966912 }
  0x3d   :  { %572 = dma.done.wait [#allocation9], 2304  }
  0x3e   :  { %573 = vsyncadd [#allocation9], 4294964992  ;;  %v581_v1 = vmov 0.0   ;;  %vm582_vm0 = vmmov 0   ;;  %v101_v2 = vld [vmem:[#allocation8 + $0x8] sm:$0xff]  ;;  %v100_v3 = vld [vmem:[#allocation8] sm:$0xff] }
  0x3f   :  { %410 = vmatprep.subr.mxu1 %v581_v1  ;;  %414 = vmatprep.mubr.msk.f32.mxu1 %vm582_vm0, %v581_v1  ;;  %v119_v4 = vld [vmem:[#allocation5] sm:$0xff]  ;;  %vm120_vm1 = vcmask 130048   ;;  %v99_v5 = vld [vmem:[#allocation7 + $0x8] sm:$0xff]  ;;  %v98_v7 = vld [vmem:[#allocation7] sm:$0xff]  ;;  %vm372_vm2 = vcmask 7168  }
  0x40   :  { %424 = vmatprep.subr.mxu0 %v581_v1  ;;  %456 = vmatprep.mubr.msk.f32.mxu0 %vm582_vm0, %v581_v1  ;;  %v117_v6 = vld [vmem:[#allocation10 + $0x78] sm:$0xff]  ;;  %v116_v8 = vld [vmem:[#allocation10 + $0x70] sm:$0xff]  ;;  %v115_v10 = vld [vmem:[#allocation10 + $0x68] sm:$0xff] }
  0x41   :  { %411 = vmatpush3.msra.mxu1 %v101_v2  ;;  %425 = vmatpush3.msra.mxu0 %v117_v6  ;;  %v118_v9 = vld [vmem:[#allocation3] sm:$0xff]  ;;  %v114_v11 = vld [vmem:[#allocation10 + $0x60] sm:$0xff]  ;;  %v113_v12 = vld [vmem:[#allocation10 + $0x58] sm:$0xff] }
  0x42   :  { %412 = vmatprep.subr.mxu1 %v581_v1  ;;  %426 = vmatprep.subr.mxu0 %v581_v1  ;;  %v112_v13 = vld [vmem:[#allocation10 + $0x50] sm:$0xff]  ;;  %v111_v14 = vld [vmem:[#allocation10 + $0x48] sm:$0xff]  ;;  %v110_v15 = vld [vmem:[#allocation10 + $0x40] sm:$0xff] }
  0x43   :  { %413 = vmatpush3.msra.mxu1 %v100_v3  ;;  %427 = vmatpush3.msra.mxu0 %v116_v8  ;;  %v109_v16 = vld [vmem:[#allocation10 + $0x38] sm:$0xff]  ;;  %v108_v17 = vld [vmem:[#allocation10 + $0x30] sm:$0xff]  ;;  %v107_v18 = vld [vmem:[#allocation10 + $0x28] sm:$0xff] }
  0x44   :  { %415 = vmatmul.mubr.msk.f32.vlgmr.msra.gmra.mxu1 %vm120_vm1, %v119_v4  ;;  %417 = vmatprep.subr.mxu1 %v581_v1  ;;  %v106_v19 = vld [vmem:[#allocation10 + $0x20] sm:$0xff]  ;;  %v105_v20 = vld [vmem:[#allocation10 + $0x18] sm:$0xff]  ;;  %v104_v21 = vld [vmem:[#allocation10 + $0x10] sm:$0xff] }
  0x45   :  { %418 = vmatpush3.msra.mxu1 %v99_v5  ;;  %421 = vmatprep.mubr.msk.f32.mxu1 %vm582_vm0, %v581_v1  ;;  %v103_v22 = vld [vmem:[#allocation10 + $0x8] sm:$0xff]  ;;  %v102_v23 = vld [vmem:[#allocation10] sm:$0xff] }
  0x46   :  { %419 = vmatprep.subr.mxu1 %v581_v1  ;;  %428 = vmatprep.subr.mxu0 %v581_v1  ;;  %v383_v27 = vld [vmem:[%s704_s4] ss:$0 sm:$0xff] }
  0x47   :  { %420 = vmatpush3.msra.mxu1 %v98_v7  ;;  %429 = vmatpush3.msra.mxu0 %v115_v10  ;;  %v384_v32 = vld [vmem:[%s706_s6] ss:$0 sm:$0xff] }
  0x48   :  { %422 = vmatmul.mubr.msk.f32.vlgmr.msra.gmra.mxu1 %vm120_vm1, %v118_v9  ;;  %430 = vmatprep.subr.mxu0 %v581_v1  ;;  %v385_v36 = vld [vmem:[%s707_s7] ss:$0 sm:$0xff] }
  0x49   :  { %431 = vmatpush3.msra.mxu0 %v114_v11  ;;  %v386_v39 = vld [vmem:[#allocation2] ss:$0 sm:$0xff] }
  0x4a   :  { %432 = vmatprep.subr.mxu0 %v581_v1 }
  0x4b   :  { %433 = vmatpush3.msra.mxu0 %v113_v12 }
  0x4c   :  { %434 = vmatprep.subr.mxu0 %v581_v1 }
  0x4d   :  { %435 = vmatpush3.msra.mxu0 %v112_v13 }
  0x4e   :  { %436 = vmatprep.subr.mxu0 %v581_v1 }
  0x4f   :  { %437 = vmatpush3.msra.mxu0 %v111_v14 }
  0x50   :  { %438 = vmatprep.subr.mxu0 %v581_v1 }
  0x51   :  { %439 = vmatpush3.msra.mxu0 %v110_v15 }
  0x52   :  { %440 = vmatprep.subr.mxu0 %v581_v1 }
  0x53   :  { %441 = vmatpush3.msra.mxu0 %v109_v16 }
  0x54   :  { %442 = vmatprep.subr.mxu0 %v581_v1 }
  0x55   :  { %443 = vmatpush3.msra.mxu0 %v108_v17 }
  0x56   :  { %444 = vmatprep.subr.mxu0 %v581_v1 }
  0x57   :  { %445 = vmatpush3.msra.mxu0 %v107_v18 }
  0x58   :  { %446 = vmatprep.subr.mxu0 %v581_v1 }
  0x59   :  { %447 = vmatpush3.msra.mxu0 %v106_v19 }
  0x5a   :  { %448 = vmatprep.subr.mxu0 %v581_v1 }
  0x5b   :  { %449 = vmatpush3.msra.mxu0 %v105_v20 }
  0x5c   :  { %450 = vmatprep.subr.mxu0 %v581_v1 }
  0x5d   :  { %451 = vmatpush3.msra.mxu0 %v104_v21 }
  0x5e   :  { %452 = vmatprep.subr.mxu0 %v581_v1 }
  0x5f   :  { %453 = vmatpush3.msra.mxu0 %v103_v22 }
  0x60   :  { %454 = vmatprep.subr.mxu0 %v581_v1 }
  0x61   :  { %455 = vmatpush3.msra.mxu0 %v102_v23 }
 0x104   :  { %v190_v24 = vpop.f32.mrf.mxu1 }
 0x106   :  { %v416_v25 = vpop.f32.mrf.mxu1 }
 0x108   :  { %v263_v26 = vpop.f32.mrf.mxu1 }
 0x109   :  { %v264_v28 = vadd.f32 %v263_v26, %v190_v24 }
 0x10a   :  { %v423_v29 = vpop.f32.mrf.mxu1 }
 0x10b   :  { %v274_v30 = vadd.f32 %v383_v27, %v264_v28 }
 0x10d   :  { %v275_v31 = vmax.f32 %v274_v30, 0.0 }
 0x10f   :  { %457 = vmatmul.mubr.f32.vlgmr.msra.gmra.mxu0 %v275_v31 }
 0x1cf   :  { %v349_v33 = vpop.f32.mrf.mxu0 }
 0x1d0   :  { %v350_v34 = vadd.f32 %v384_v32, %v349_v33 }
 0x1d1   :  { %v458_v35 = vpop.f32.mrf.mxu0 }
 0x1d2   :  { %v353_v37 = vmax.f32 %v350_v34, 0.0 }
 0x1d4   :  { %v361_v38 = vmul.f32 %v385_v36, %v353_v37 }
 0x1d6   :  { %362 = vadd.xlane.f32.xlu0 %v361_v38 }
 0x25f   :  { %v363_v40 = vpop.xlane.xlu0 %362 }
 0x260   :  { %v371_v41 = vadd.f32 %v386_v39, %v363_v40 }
 0x262   :  { %373 = vst.msk [vmem:[%s709_s9] sm:$0xff] %vm372_vm2, %v371_v41 }
 0x263   :  { %378 = vsyncpa [#allocation4], 1 }
 0x264   :  { %379 = vsyncpa [#allocation6], 1 }
 0x265   :  { %380 = vsyncpa [#allocation9], 1 }

</bundles_post_ra>
